<compile_context>
chip_gen: v6e
topology: v6e:2x2x1
jax: 0.10.0
libtpu: 0.0.40
codegen_flags: <defaults>
</compile_context>

<pallas_src>
import functools

import jax
import jax.numpy as jnp
from jax.experimental import pallas as pl
from jax.experimental.pallas import tpu as pltpu


def _self_output_kernel(x_ref, res_ref, w_ref, p_ref, o_ref, *, eps: float):
    """One (block_m, H) row tile: LayerNorm(x @ W_t + b + residual)."""
    # MXU matmul in the streaming dtype (bf16 stays bf16), f32 accumulation.
    y = jnp.dot(x_ref[...], w_ref[...], preferred_element_type=jnp.float32)

    bias = p_ref[0:1, :]        # (1, H) f32
    gamma = p_ref[1:2, :]       # (1, H) f32
    beta = p_ref[2:3, :]        # (1, H) f32

    # TODO(synk): training-mode dropout (hidden_dropout_prob) not implemented;
    # this matches nn.Dropout in eval mode (identity).
    z = y + bias + res_ref[...].astype(jnp.float32)          # (bm, H) f32

    # LayerNorm over hidden axis (biased variance, eps inside rsqrt, like torch).
    mean = jnp.mean(z, axis=-1, keepdims=True)
    zc = z - mean
    var = jnp.mean(zc * zc, axis=-1, keepdims=True)
    inv = jax.lax.rsqrt(var + jnp.float32(eps))               # EUP rsqrt
    # Fold row scale and gamma into one multiplier (fewer live f32 slabs).
    o_ref[...] = (zc * (inv * gamma) + beta).astype(o_ref.dtype)


def _round_up(x: int, m: int) -> int:
    return ((x + m - 1) // m) * m


def prepare_dense_weight(torch_layout_weight: jax.Array) -> jax.Array:
    """One-time (parameter-load) conversion of nn.Linear weight (H_out, H_in)
    to the (H_in, H_out) layout the kernel consumes, so no per-call HBM
    transpose sits in front of the fused kernel."""
    return jnp.asarray(torch_layout_weight).T


def bert_self_output(hidden_states: jax.Array,
                     input_tensor: jax.Array,
                     weight_t: jax.Array,     # (H_in, H_out), pre-transposed
                     bias: jax.Array,         # (H,)
                     ln_gamma: jax.Array,     # (H,)
                     ln_beta: jax.Array,      # (H,)
                     *,
                     eps: float = 1e-12,
                     block_m: int = 512,
                     compute_dtype=None) -> jax.Array:
    """Pallas equivalent of MyBertSelfOutput.forward (inference).

    compute_dtype: optional dtype (e.g. jnp.bfloat16) for the streamed x /
    residual / weight operands; accumulation and LayerNorm stay in f32.
    """
    B, S, H = hidden_states.shape
    assert input_tensor.shape == (B, S, H)
    assert weight_t.shape == (H, H)
    M = B * S

    out_dtype = hidden_states.dtype
    stream_dtype = (jnp.dtype(compute_dtype) if compute_dtype is not None
                    else hidden_states.dtype)

    x = hidden_states.reshape(M, H).astype(stream_dtype)
    r = input_tensor.reshape(M, H).astype(stream_dtype)
    w = weight_t.astype(stream_dtype)
    # bias / gamma / beta fused into a single (3, H) f32 operand: one DMA.
    params = jnp.stack([bias, ln_gamma, ln_beta]).astype(jnp.float32)

    # Fixed, sublane-aligned row tile; ragged last tile is safe because every
    # op is row-wise (padded rows are discarded).  Keep >= 2 grid steps
    # whenever possible so megacore sharding / pipelining engage.
    bm = min(block_m, max(8, _round_up(pl.cdiv(M, 2), 8)))
    grid = (pl.cdiv(M, bm),)

    itemsize = jnp.dtype(stream_dtype).itemsize
    cost = pl.CostEstimate(
        flops=2 * M * H * H + 10 * M * H,
        transcendentals=0,
        bytes_accessed=(2 * M * H * itemsize                    # x + residual
                        + M * H * jnp.dtype(out_dtype).itemsize  # out
                        + H * H * itemsize                        # weight (once)
                        + 3 * H * 4))                             # params

    kernel = functools.partial(_self_output_kernel, eps=float(eps))
    # NOTE: for block_m >= 1024 or H >= 2048 on v7x, add a K grid axis with an
    # f32 accumulator and/or set vmem_limit_bytes; defaults are fine for BERT
    # hidden sizes (<= 1024) with block_m <= 512.
    out = pl.pallas_call(
        kernel,
        out_shape=jax.ShapeDtypeStruct((M, H), out_dtype),
        grid_spec=pl.GridSpec(
            grid=grid,
            in_specs=[
                pl.BlockSpec((bm, H), lambda i: (i, 0)),        # x tile (streamed)
                pl.BlockSpec((bm, H), lambda i: (i, 0)),        # residual tile
                # Constant blocks: fetched once; single buffer saves VMEM
                # (biggest win on v7x's 64 MiB VMEM).
                pl.BlockSpec((H, H), lambda i: (0, 0),
                             pipeline_mode=pl.Buffered(1)),      # weight (resident)
                pl.BlockSpec((3, H), lambda i: (0, 0),
                             pipeline_mode=pl.Buffered(1)),      # bias/gamma/beta
            ],
            out_specs=pl.BlockSpec((bm, H), lambda i: (i, 0)),
        ),
        compiler_params=pltpu.CompilerParams(
            dimension_semantics=("parallel",)),   # rows independent -> megacore
        cost_estimate=cost,
    )(x, r, w, params)
    return out.reshape(B, S, H)


def _reference(hidden_states, input_tensor, weight, bias, gamma, beta, eps=1e-12):
    """Pure-JAX reference identical to the PyTorch module (eval mode)."""
    y = jnp.einsum("bsh,oh->bso", hidden_states, weight) + bias
    z = y + input_tensor
    mean = jnp.mean(z, axis=-1, keepdims=True)
    var = jnp.mean((z - mean) ** 2, axis=-1, keepdims=True)
    return (z - mean) / jnp.sqrt(var + eps) * gamma + beta


if __name__ == "__main__":
    # Small config consistent with the module: batch=2, seq=8, hidden=32.
    batch, seq, hidden = 2, 8, 32
    eps = 1e-12

    key = jax.random.PRNGKey(0)
    k1, k2, k3, k4, k5, k6 = jax.random.split(key, 6)
    hidden_states = jax.random.normal(k1, (batch, seq, hidden), jnp.float32)
    input_tensor = jax.random.normal(k2, (batch, seq, hidden), jnp.float32)
    weight = jax.random.normal(k3, (hidden, hidden), jnp.float32) * 0.02  # (H_out, H_in)
    bias = jax.random.normal(k4, (hidden,), jnp.float32) * 0.02
    ln_gamma = 1.0 + 0.1 * jax.random.normal(k5, (hidden,), jnp.float32)
    ln_beta = 0.1 * jax.random.normal(k6, (hidden,), jnp.float32)

    # One-time layout conversion at "parameter load" (outside the hot path).
    weight_t = prepare_dense_weight(weight)

    ref = _reference(hidden_states, input_tensor, weight, bias,
                     ln_gamma, ln_beta, eps=eps)

    # f32 streams (input dtype): tight match against the reference.
    out = bert_self_output(hidden_states, input_tensor, weight_t, bias,
                           ln_gamma, ln_beta, eps=eps)
    out = jax.block_until_ready(out)
    assert out.shape == (batch, seq, hidden), out.shape
    assert out.dtype == jnp.float32, out.dtype
    assert jnp.allclose(out, ref, atol=1e-5, rtol=1e-5), (
        float(jnp.max(jnp.abs(out - ref))))

    # bf16 streaming path (fast-MXU / half-I/O configuration for real models).
    out_bf16 = bert_self_output(hidden_states, input_tensor, weight_t, bias,
                                ln_gamma, ln_beta, eps=eps,
                                compute_dtype=jnp.bfloat16)
    out_bf16 = jax.block_until_ready(out_bf16)
    assert out_bf16.shape == (batch, seq, hidden), out_bf16.shape
    assert jnp.allclose(out_bf16, ref, atol=5e-2, rtol=5e-2), (
        float(jnp.max(jnp.abs(out_bf16 - ref))))

    print("KERNEL_OK")
</pallas_src>

<mosaic_0001>
module attributes {stable_mosaic.version = 11 : i64} {
  func.func @_self_output_kernel(%arg0: i32, %arg1: memref<8x32xf32, #tpu.memory_space<vmem>>, %arg2: memref<8x32xf32, #tpu.memory_space<vmem>>, %arg3: memref<32x32xf32, #tpu.memory_space<vmem>>, %arg4: memref<3x32xf32, #tpu.memory_space<vmem>>, %arg5: memref<8x32xf32, #tpu.memory_space<vmem>>) attributes {dimension_semantics = [#tpu.dimension_semantics<parallel>], iteration_bounds = array<i64: 2>, scalar_prefetch = 0 : i64, scratch_operands = 0 : i64, tpu.core_type = #tpu.core_type<tc>, window_params = [{transform_indices = @transform_0, window_bounds = array<i64: 8, 32>}, {transform_indices = @transform_1, window_bounds = array<i64: 8, 32>}, {pipeline_mode = #tpu.pipeline_mode<synchronous>, transform_indices = @transform_2, window_bounds = array<i64: 32, 32>}, {pipeline_mode = #tpu.pipeline_mode<synchronous>, transform_indices = @transform_3, window_bounds = array<i64: 3, 32>}, {transform_indices = @transform_4, window_bounds = array<i64: 8, 32>}]} {
    %c0 = arith.constant 0 : index
    %c0_0 = arith.constant 0 : index
    %0 = vector.load %arg1[%c0, %c0_0] : memref<8x32xf32, #tpu.memory_space<vmem>>, vector<8x32xf32>
    %c0_1 = arith.constant 0 : index
    %c0_2 = arith.constant 0 : index
    %1 = vector.load %arg3[%c0_1, %c0_2] : memref<32x32xf32, #tpu.memory_space<vmem>>, vector<32x32xf32>
    %cst = arith.constant dense<0.000000e+00> : vector<8x32xf32>
    %2 = tpu.matmul %0, %1, %cst {dimension_numbers = #tpu.dot_dimension_numbers<[1], [0], [0], [1], [0, 0, 1, 1], [], []>} : vector<8x32xf32>, vector<32x32xf32>, vector<8x32xf32> -> vector<8x32xf32>
    %c0_3 = arith.constant 0 : index
    %c0_4 = arith.constant 0 : index
    %3 = vector.load %arg4[%c0_3, %c0_4] : memref<3x32xf32, #tpu.memory_space<vmem>>, vector<1x32xf32>
    %c1 = arith.constant 1 : index
    %c0_5 = arith.constant 0 : index
    %4 = vector.load %arg4[%c1, %c0_5] : memref<3x32xf32, #tpu.memory_space<vmem>>, vector<1x32xf32>
    %c2 = arith.constant 2 : index
    %c0_6 = arith.constant 0 : index
    %5 = vector.load %arg4[%c2, %c0_6] : memref<3x32xf32, #tpu.memory_space<vmem>>, vector<1x32xf32>
    %6 = vector.broadcast %3 : vector<1x32xf32> to vector<8x32xf32>
    %7 = arith.addf %2, %6 : vector<8x32xf32>
    %c0_7 = arith.constant 0 : index
    %c0_8 = arith.constant 0 : index
    %8 = vector.load %arg2[%c0_7, %c0_8] : memref<8x32xf32, #tpu.memory_space<vmem>>, vector<8x32xf32>
    %9 = arith.addf %7, %8 : vector<8x32xf32>
    %cst_9 = arith.constant dense<0.000000e+00> : vector<8xf32>
    %10 = vector.multi_reduction <add>, %9, %cst_9 [1] : vector<8x32xf32> to vector<8xf32>
    %11 = vector.shape_cast %10 : vector<8xf32> to vector<8x1xf32>
    %cst_10 = arith.constant 3.200000e+01 : f32
    %12 = vector.broadcast %cst_10 : f32 to vector<8x1xf32>
    %13 = arith.divf %11, %12 : vector<8x1xf32>
    %14 = vector.broadcast %13 : vector<8x1xf32> to vector<8x32xf32>
    %15 = arith.subf %9, %14 : vector<8x32xf32>
    %16 = arith.mulf %15, %15 : vector<8x32xf32>
    %cst_11 = arith.constant dense<0.000000e+00> : vector<8xf32>
    %17 = vector.multi_reduction <add>, %16, %cst_11 [1] : vector<8x32xf32> to vector<8xf32>
    %18 = vector.shape_cast %17 : vector<8xf32> to vector<8x1xf32>
    %cst_12 = arith.constant 3.200000e+01 : f32
    %19 = vector.broadcast %cst_12 : f32 to vector<8x1xf32>
    %20 = arith.divf %18, %19 : vector<8x1xf32>
    %cst_13 = arith.constant 9.99999996E-13 : f32
    %21 = vector.broadcast %cst_13 : f32 to vector<8x1xf32>
    %22 = arith.addf %20, %21 : vector<8x1xf32>
    %23 = math.rsqrt %22 : vector<8x1xf32>
    %24 = vector.broadcast %23 : vector<8x1xf32> to vector<8x32xf32>
    %25 = vector.broadcast %4 : vector<1x32xf32> to vector<8x32xf32>
    %26 = arith.mulf %24, %25 : vector<8x32xf32>
    %27 = arith.mulf %15, %26 : vector<8x32xf32>
    %28 = vector.broadcast %5 : vector<1x32xf32> to vector<8x32xf32>
    %29 = arith.addf %27, %28 : vector<8x32xf32>
    %c0_14 = arith.constant 0 : index
    %c0_15 = arith.constant 0 : index
    %30 = vector.load %arg5[%c0_14, %c0_15] : memref<8x32xf32, #tpu.memory_space<vmem>>, vector<8x32xf32>
    tpu.vector_store %arg5[%c0_14, %c0_15], %29 {strides = array<i32>} : memref<8x32xf32, #tpu.memory_space<vmem>>, vector<8x32xf32>,
    return
  }
  func.func @transform_0(%arg0: i32) -> (i32, i32) {
    %c0_i32 = arith.constant 0 : i32
    %c0_i32_0 = arith.constant 0 : i32
    return %arg0, %c0_i32 : i32, i32
  }
  func.func @transform_1(%arg0: i32) -> (i32, i32) {
    %c0_i32 = arith.constant 0 : i32
    %c0_i32_0 = arith.constant 0 : i32
    return %arg0, %c0_i32 : i32, i32
  }
  func.func @transform_2(%arg0: i32) -> (i32, i32) {
    %c0_i32 = arith.constant 0 : i32
    %c0_i32_0 = arith.constant 0 : i32
    %c0_i32_1 = arith.constant 0 : i32
    return %c0_i32, %c0_i32_0 : i32, i32
  }
  func.func @transform_3(%arg0: i32) -> (i32, i32) {
    %c0_i32 = arith.constant 0 : i32
    %c0_i32_0 = arith.constant 0 : i32
    %c0_i32_1 = arith.constant 0 : i32
    return %c0_i32, %c0_i32_0 : i32, i32
  }
  func.func @transform_4(%arg0: i32) -> (i32, i32) {
    %c0_i32 = arith.constant 0 : i32
    %c0_i32_0 = arith.constant 0 : i32
    return %arg0, %c0_i32 : i32, i32
  }
}

</mosaic_0001>

<bundles_post_ra>
// kernel: tpu_custom_call.1
= control target key start
LH: loop header
LB: loop body
LE: loop exit
PB: predicated region body
PF: predicated region fallthrough
CT: control target
= control target key end

     0   :  { %s998_s0 = inlined_call_operand.hbm [shape: f32[16,32], index: 0, kind: input, shape index: {}]   ;;  %s999_s1 = inlined_call_operand.hbm [shape: f32[16,32], index: 1, kind: input, shape index: {}]   ;;  %s1000_s2 = inlined_call_operand.hbm [shape: f32[32,32], index: 2, kind: input, shape index: {}]   ;;  %s1001_s3 = inlined_call_operand.vmem [shape: f32[3,32], index: 3, kind: input, shape index: {}]   ;;  %s1002_s4 = inlined_call_operand.hbm [shape: f32[16,32], index: 4, kind: output, shape index: {}]  }
   0x1   :  { %1007 = sst [smem:[#allocation13_spill]] %s1000_s2 }
   0x2   :  { %9 = vsyncpa [#allocation3], 0 }
   0x3   :  { %11 = vsyncpa [#allocation3 + $0x1], 0 }
   0x4   :  { %12 = vsyncpa [#allocation6], 0 }
   0x5   :  { %14 = vsyncpa [#allocation6 + $0x1], 0 }
   0x6   :  { %15 = vsyncpa [#allocation4], 0 }
   0x7   :  { %17 = vsyncpa [#allocation4 + $0x1], 0  ;;  %s787_s15 = smov 0   ;;  %s789_s16 = smov 0  }
   0x8   :  { %s791_s17 = smov 0   ;;  %s793_s18 = smov 0  }
   0x9 LB: > { %s808_s19 = sadd.s32 4294967295, %s752_s18   ;;  %s493_s20 = sadd.s32 4294967294, %s752_s18   ;;  %s752_s18 = sphi %s793_s18, %s1026_s18   ;;  %s748_s17 = sphi %s791_s17, %s1025_s17   ;;  %s744_s16 = sphi %s789_s16, %s1024_s16   ;;  %s740_s15 = sphi %s787_s15, %s1023_s15  }
   0xa   : > { %p43_p0 = scmp.ne.s32.totalorder %s744_s16, %s740_s15  ;;  %p1003_p1 = scmp.eq.s32.totalorder %s808_s19, 0 }
   0xb   : > { %p141_p3 = scmp.eq.s32.totalorder %s493_s20, 1  ;;  %p494_p5 = scmp.ge.s32.totalorder %s752_s18, 1 }
   0xc   : > { %p817_p4 = por %p1003_p1, %p43_p0  ;;  %p148_p7 = scmp.lt.s32.totalorder %s752_s18, 3 }
   0xd   : > { %p822_p6 = por %p141_p3, %p43_p0  ;;  %s754_s24 = smov [#allocation7]  }
   0xe   : > { %s1008_s21 = scalar_select %p817_p4, 1, 0 }
   0xf   : > { %s1009_s22 = scalar_select %p822_p6, 1, 0 }
  0x10   : > { %p827_p8 = pnand %p494_p5, %p148_p7  ;;  %s160_s25 = sshll.u32 %s754_s24, 4  ;;  %s161_s25 = int_to_ptr.vmem [resolvable:$true] %s160_s25 }
  0x11   : > { %s841_s27 = sadd.s32 1, %s752_s18   ;;  %s30_s28 = sadd.s32 1, %s748_s17 }
  0x12   : > { %s1010_s23 = scalar_select %p827_p8, 1, 0 }
  0x13   : > { %p540_p9 = pneg %p827_p8  ;;  %s27_s29 = ssub.s32 %s752_s18, %s841_s27 }
  0x14   : > { %s609_s30 = scalar_lea.vmem %s161_s25, 512  ;;  %p617_p5 = scmp.lt.s32.totalorder %s161_s25, %s161_s25 }
  0x15   : > { %p836_p11 = pnand %p540_p9, %p1003_p1  ;;  %p610_p13 = scmp.ne.s32.totalorder %s161_s25, %s609_s30 }
  0x16   : > { %p618_p7 = scmp.lt.s32.totalorder %s609_s30, %s609_s30 }
  0x17   : > { %p600_p12 = pneg %p836_p11 }
  0x18   : > { %p619_p10 = por %p618_p7, %p617_p5 }
  0x19   : > { %p612_p0 = pnand %p610_p13, %p600_p12 }
  0x1b   : > { %p613_p3 = pneg %p612_p0 }
  0x1d   : > { %p620_p2 = pnand %p619_p10, %p613_p3 }
  0x1f   : > { %623 = shalt.err (!%p620_p2)
}
  0x20   : > { %s755_s5 = smov 128   ;;  %s756_s6 = smov 8  }
  0x21   : > { %s1012_s2 = sld [smem:[#allocation13_spill]]  ;;  %p28_p9 = scmp.eq.s32.totalorder %s27_s29, 0 }
  0x22   : > { %p37_p12 = scmp.ne.s32.totalorder %s748_s17, %s744_s16  ;;  %p38_p10 = scmp.eq.s32.totalorder %s752_s18, 0 }
  0x23   : > { %p556_p2 = scmp.lt.s32.totalorder %s752_s18, 2  ;;  %p1013_p0 = scmp.eq.s32.totalorder %s808_s19, 1 }
  0x24   : > { %s858_s9 = scalar_select %p28_p9, %s748_s17, %s30_s28  }
  0x25   : > { %p39_p13 = por %p38_p10, %p37_p12  ;;  %p862_p3 = por %p1013_p0, %p37_p12 }
  0x26   : > { %s177_s11 = sand.u32 1, %s748_s17   ;;  %s498_s12 = sshll.u32 %s752_s18, 7 }
  0x27   : > { %543 = dma.hbm_to_vmem [thread:$0]  (!%p836_p11), %s1012_s2, 512, %s161_s25, [#allocation6], %s755_s5, %s755_s5, %s756_s6  }
  0x28   : > { %s1014_s10 = scalar_select %p862_p3, 1, 0 }
  0x29   : > { %s868_s13 = sshll.u32 %s177_s11, 3  ;;  %s873_s24 = scalar_lea.hbm %s998_s0, %s498_s12 }
  0x2a   : > { %s181_s25 = scalar_lea.vmem [#allocation2], %s868_s13  ;;  %p876_p11 = pnand %p556_p2, %p39_p13 }
  0x2b   : > { %s188_s26 = sshll.u32 %s181_s25, 4  ;;  %s883_s5 = scalar_lea.hbm %s999_s1, %s498_s12  ;;  %s189_s26 = int_to_ptr.vmem [resolvable:$true] %s188_s26 }
  0x2c   : > { %s178_s6 = scalar_lea.sflag [#allocation3], %s177_s11  ;;  %s624_s7 = scalar_lea.hbm %s873_s24, 128 }
  0x2d   : > { %p625_p5 = scmp.ne.s32.totalorder %s873_s24, %s624_s7  ;;  %p626_p7 = pneg %p876_p11 }
  0x2e   : > { %s629_s20 = scalar_lea.hbm %s998_s0, 256  ;;  %p630_p10 = scmp.lt.s32.totalorder %s873_s24, %s998_s0 }
  0x2f   : > { %p627_p9 = pnand %p626_p7, %p625_p5  ;;  %p631_p2 = scmp.lt.s32.totalorder %s629_s20, %s624_s7 }
  0x31   : > { %p628_p12 = pneg %p627_p9  ;;  %p632_p13 = por %p631_p2, %p630_p10 }
  0x33   : > { %p633_p0 = pnand %p632_p13, %p628_p12 }
  0x35   : > { %636 = shalt.err (!%p633_p0)
}
  0x36   : > { %s637_s11 = scalar_lea.vmem %s189_s26, 128  ;;  %s757_s12 = smov [#allocation2]  }
  0x37   : > { %p638_p1 = scmp.ne.s32.totalorder %s189_s26, %s637_s11  ;;  %s642_s29 = sshll.u32 %s757_s12, 4  ;;  %s643_s29 = int_to_ptr.vmem [resolvable:$false] %s642_s29 }
  0x38   : > { %s644_s30 = scalar_lea.vmem %s643_s29, 256  ;;  %p645_p9 = scmp.lt.s32.totalorder %s189_s26, %s643_s29 }
  0x39   : > { %p640_p6 = pnand %p638_p1, %p626_p7  ;;  %p646_p3 = scmp.lt.s32.totalorder %s644_s30, %s637_s11 }
  0x3b   : > { %p641_p5 = pneg %p640_p6  ;;  %p647_p4 = por %p646_p3, %p645_p9 }
  0x3d   : > { %p648_p8 = pnand %p647_p4, %p641_p5 }
  0x3f   : > { %651 = shalt.err (!%p648_p8)
}
  0x40   : > { %547 = dma.hbm_to_vmem [thread:$0]  (!%p876_p11), %s873_s24, 128, %s189_s26, %s178_s6  }
  0x41   : > { %s195_s2 = sand.u32 1, %s752_s18   ;;  %s199_s7 = scalar_lea.vmem [#allocation5], %s868_s13 }
  0x42   : > { %s206_s8 = sshll.u32 %s199_s7, 4  ;;  %s196_s14 = scalar_lea.sflag [#allocation6], %s195_s2  ;;  %s207_s8 = int_to_ptr.vmem [resolvable:$true] %s206_s8 }
  0x43   : > { %s652_s20 = scalar_lea.hbm %s883_s5, 128  ;;  %s657_s12 = scalar_lea.hbm %s999_s1, 256 }
  0x44   : > { %p653_p1 = scmp.ne.s32.totalorder %s883_s5, %s652_s20  ;;  %p658_p8 = scmp.lt.s32.totalorder %s883_s5, %s999_s1 }
  0x45   : > { %p659_p3 = scmp.lt.s32.totalorder %s657_s12, %s652_s20 }
  0x46   : > { %p655_p4 = pnand %p653_p1, %p626_p7 }
  0x47   : > { %p660_p12 = por %p659_p3, %p658_p8 }
  0x48   : > { %p656_p6 = pneg %p655_p4 }
  0x4a   : > { %p661_p10 = pnand %p660_p12, %p656_p6 }
  0x4c   : > { %664 = shalt.err (!%p661_p10)
}
  0x4d   : > { %s665_s13 = scalar_lea.vmem %s207_s8, 128  ;;  %s758_s24 = smov [#allocation5]  }
  0x4e   : > { %p666_p2 = scmp.ne.s32.totalorder %s207_s8, %s665_s13  ;;  %s670_s26 = sshll.u32 %s758_s24, 4  ;;  %s671_s26 = int_to_ptr.vmem [resolvable:$false] %s670_s26 }
  0x4f   : > { %s672_s6 = scalar_lea.vmem %s671_s26, 256  ;;  %p673_p5 = scmp.lt.s32.totalorder %s207_s8, %s671_s26 }
  0x50   : > { %p668_p13 = pnand %p666_p2, %p626_p7  ;;  %p674_p9 = scmp.lt.s32.totalorder %s672_s6, %s665_s13 }
  0x52   : > { %p669_p0 = pneg %p668_p13  ;;  %p675_p1 = por %p674_p9, %p673_p5 }
  0x54   : > { %p676_p4 = pnand %p675_p1, %p669_p0 }
  0x56   : > { %679 = shalt.err (!%p676_p4)
}
  0x57   : > { %550 = dma.hbm_to_vmem [thread:$0]  (!%p876_p11), %s883_s5, 128, %s207_s8, %s196_s14  }
  0x58   : > { %p1016_p6 = scmp.ne.s32.totalorder %s1010_s23, 0 }
  0x59   : > { %s928_s2 = sand.u32 (!%p1016_p6), 1, %s744_s16   ;;  %p1017_p7 = scmp.ne.s32.totalorder (!%p1016_p6), %s1008_s21, 0 }
  0x5a   : > { %215 = sbr.rel (%p1016_p6) target bundleno = 629 (0x275), region = 36  ;;  %s931_s7 = sshll.u32 (!%p1016_p6), %s928_s2, 3 }
  0x5b   : > { %s218_s20 = scalar_lea.sflag (!%p1016_p6), [#allocation3], %s928_s2  ;;  %s221_s25 = scalar_lea.vmem (!%p1016_p6), [#allocation2], %s931_s7 }
  0x5f   : > { %723 = dma.done.wait (%p1017_p7), %s218_s20, 128  }
  0x60   : > { %725 = vsyncadd (%p1017_p7), %s218_s20, 4294967168  ;;  %s226_s23 = sand.u32 1, %s808_s19   ;;  %s230_s5 = scalar_lea.vmem [#allocation5], %s931_s7 }
  0x61   : > { %s227_s28 = scalar_lea.sflag [#allocation6], %s226_s23 }
  0x62   : > { %727 = dma.done.wait (%p1017_p7), %s227_s28, 128  }
  0x63   : > { %729 = vsyncadd (%p1017_p7), %s227_s28, 4294967168  ;;  %p1018_p11 = scmp.eq.s32.totalorder %s808_s19, 0 }
  0x65   : > { %731 = dma.done.wait (%p1018_p11), [#allocation6], 512   ;;  %p1019_p8 = pmov %p1018_p11 }
  0x66   : > { %v759_v0 = vmov 0.0   ;;  %vm760_vm0 = vmmov 0   ;;  %v268_v1 = vld [vmem:[#allocation7 + $0x18] sm:$0xff]  ;;  %v267_v2 = vld [vmem:[#allocation7 + $0x10] sm:$0xff]  ;;  %v266_v3 = vld [vmem:[#allocation7 + $0x8] sm:$0xff]  ;;  %vm276_vm1 = vcmask 261120  }
  0x67   : > { %733 = vsyncadd (%p1019_p8), [#allocation6], 4294966784  ;;  %519 = vmatprep.subr.mxu0 %v759_v0  ;;  %527 = vmatprep.mubr.msk.f32.mxu0 %vm760_vm0, %v759_v0  ;;  %v265_v4 = vld [vmem:[#allocation7] sm:$0xff]  ;;  %v350_v8 = vld [vmem:[%s230_s5] sm:$0xff]  ;;  %s511_s30 = sshll.u32 %s808_s19, 7  ;;  %s263_s13 = scalar_lea.vmem [#allocation8], %s931_s7 }
  0x68   : > { %520 = vmatpush3.msra.mxu0 %v268_v1  ;;  %v264_v5 = vld [vmem:[%s221_s25] sm:$0xff]  ;;  %s391_s24 = sshll.u32 %s263_s13, 4  ;;  %s389_s20 = scalar_lea.hbm %s1002_s4, %s511_s30  ;;  %s392_s24 = int_to_ptr.vmem [resolvable:$true] %s391_s24 }
  0x69   : > { %521 = vmatprep.subr.mxu0 %v759_v0  ;;  %v506_v6 = vld [vmem:[%s1001_s3] ss:$0 sm:$0xff]  ;;  %v508_v21 = vld [vmem:[%s1001_s3 + $0x1] ss:$0 sm:$0xff]  ;;  %v509_v24 = vld [vmem:[%s1001_s3 + $0x2] ss:$0 sm:$0xff] }
  0x6a   : > { %522 = vmatpush3.msra.mxu0 %v267_v2  ;;  %s378_s25 = scalar_lea.sflag [#allocation4], %s928_s2  ;;  %s680_s23 = scalar_lea.vmem %s392_s24, 128 }
  0x6b   : > { %523 = vmatprep.subr.mxu0 %v759_v0  ;;  %p681_p3 = scmp.ne.s32.totalorder %s392_s24, %s680_s23  ;;  %p1020_p12 = scmp.ne.s32.totalorder %s1014_s10, 0 }
  0x6c   : > { %524 = vmatpush3.msra.mxu0 %v266_v3  ;;  %s761_s28 = smov [#allocation8]  }
  0x6d   : > { %525 = vmatprep.subr.mxu0 %v759_v0  ;;  %p682_p10 = pnand %p681_p3, %p1020_p12  ;;  %s684_s5 = sshll.u32 %s761_s28, 4  ;;  %s685_s5 = int_to_ptr.vmem [resolvable:$false] %s684_s5 }
  0x6e   : > { %526 = vmatpush3.msra.mxu0 %v265_v4  ;;  %s686_s19 = scalar_lea.vmem %s685_s5, 256  ;;  %p687_p13 = scmp.lt.s32.totalorder %s392_s24, %s685_s5 }
  0x6f   : > { %528 = vmatmul.mubr.msk.f32.vlgmr.msra.gmra.mxu0 %vm276_vm1, %v264_v5  ;;  %p683_p2 = pneg %p682_p10  ;;  %p688_p0 = scmp.lt.s32.totalorder %s686_s19, %s680_s23 }
  0x71   : > { %p689_p5 = por %p688_p0, %p687_p13 }
  0x73   : > { %p690_p9 = pnand %p689_p5, %p683_p2 }
 0x12f   : > { %v346_v7 = vpop.f32.mrf.mxu0 }
 0x130   : > { %v347_v9 = vadd.f32 %v506_v6, %v346_v7 }
 0x131   : > { %v529_v10 = vpop.f32.mrf.mxu0 }
 0x132   : > { %v351_v11 = vadd.f32 %v350_v8, %v347_v9 }
 0x134   : > { %v352_v12 = vsel %vm276_vm1, %v351_v11, 0.0 }
 0x135   : > { %353 = vadd.xlane.f32.xlu0 %v352_v12 }
 0x1be   : > { %v354_v13 = vpop.xlane.xlu0 %353 }
 0x1bf   : > { %v356_v14 = vmul.f32 0.03125, %v354_v13 }
 0x1c1   : > { %v357_v15 = vsub.f32 %v351_v11, %v356_v14 }
 0x1c3   : > { %v358_v16 = vmul.f32 %v357_v15, %v357_v15 }
 0x1c5   : > { %v359_v17 = vsel %vm276_vm1, %v358_v16, 0.0 }
 0x1c6   : > { %360 = vadd.xlane.f32.xlu0 %v359_v17 }
 0x24f   : > { %v361_v18 = vpop.xlane.xlu0 %360 }
 0x250   : > { %v362_v19 = vmul.f32 0.03125, %v361_v18 }
 0x252   : > { %v363_v20 = vadd.f32 1e-12, %v362_v19 }
 0x254   : > { %596 = vrsqrt.f32 %v363_v20 }
 0x261   : > { %v597_v22 = vpop.eup %596 }
 0x262   : > { %v369_v23 = vmul.f32 %v597_v22, %v508_v21 }
 0x264   : > { %v370_v25 = vmul.f32 %v369_v23, %v357_v15 }
 0x266   : > { %v375_v26 = vadd.f32 %v509_v24, %v370_v25 }
 0x268   : > { %376 = vst.msk [vmem:[%s263_s13] sm:$0xff] %vm276_vm1, %v375_v26 }
 0x269   : > { %693 = shalt.err (!%p690_p9)
}
 0x26a   : > { %s694_s7 = scalar_lea.hbm %s389_s20, 128  ;;  %s698_s8 = scalar_lea.hbm %s1002_s4, 256 }
 0x26b   : > { %p695_p1 = scmp.ne.s32.totalorder %s389_s20, %s694_s7  ;;  %p699_p7 = scmp.lt.s32.totalorder %s389_s20, %s1002_s4 }
 0x26c   : > { %p700_p11 = scmp.lt.s32.totalorder %s698_s8, %s694_s7 }
 0x26d   : > { %p696_p4 = pnand %p695_p1, %p1020_p12 }
 0x26e   : > { %p701_p8 = por %p700_p11, %p699_p7 }
 0x26f   : > { %p697_p6 = pneg %p696_p4 }
 0x271   : > { %p702_p3 = pnand %p701_p8, %p697_p6 }
 0x273   : > { %705 = shalt.err (!%p702_p3)
}
 0x274   : > { %538 = dma.vmem_to_hbm [thread:$0]  (%p1020_p12), %s392_s24, 128, %s389_s20, %s378_s25  }
 0x275 PF: > { %s403_s12 = sand.u32 1, %s740_s15   ;;  %p1021_p10 = scmp.ne.s32.totalorder %s1009_s22, 0 }
 0x276   : > { %p1022_p2 = scmp.ge.s32.totalorder %s752_s18, 2  ;;  %s404_s29 = scalar_lea.sflag [#allocation4], %s403_s12 }
 0x278   : > { %p552_p13 = pnand %p1022_p2, %p1021_p10 }
 0x27a   : > { %p553_p0 = pneg %p552_p13 }
 0x27c   : > { %735 = dma.done.wait (%p553_p0), %s404_s29, 128  }
 0x27d   : > { %737 = vsyncadd (%p553_p0), %s404_s29, 4294967168  ;;  %p20_p5 = scmp.ge.s32.totalorder %s841_s27, 4   ;;  %s1023_s15 = smov %s744_s16 }
 0x27e   : > { %s1024_s16 = smov %s748_s17  ;;  %s1025_s17 = smov %s858_s9 }
 0x27f   : > { %s1026_s18 = smov %s841_s27  ;;  %22 = sbr.rel (!%p20_p5) target bundleno = 9 (0x9), region = 98 }
 0x284   :  { %409 = vsyncpa [#allocation3], 1 }
 0x285   :  { %411 = vsyncpa [#allocation3 + $0x1], 1 }
 0x286   :  { %412 = vsyncpa [#allocation6], 1 }
 0x287   :  { %414 = vsyncpa [#allocation6 + $0x1], 1 }
 0x288   :  { %415 = vsyncpa [#allocation4], 1 }
 0x289   :  { %417 = vsyncpa [#allocation4 + $0x1], 1 }

</bundles_post_ra>
